<compile_context>
chip_gen: v6e
topology: v6e:2x2x1
jax: 0.10.0
libtpu: 0.0.40
codegen_flags: <defaults>
</compile_context>

<pallas_src>
import functools

import jax
import jax.numpy as jnp
from jax.experimental import pallas as pl
from jax.experimental.pallas import tpu as pltpu

IN1, OUT1, OUT1_PAD = 4096, 1000, 1024   # fc, padded to a 128-multiple
IN2, OUT2 = 1000, 48000                  # fc1


def _linear_kernel(x_ref, w_ref, b_ref, o_ref):
    """One (B, tn) output tile of y = x @ w + b, accumulated over the K grid axis.

    The output BlockSpec index_map is constant in k, so o_ref (f32) stays
    VMEM-resident across the reduction axis and doubles as the accumulator.
    """
    k = pl.program_id(1)

    @pl.when(k == 0)
    def _():
        # Initialize the resident tile with the broadcast bias.
        o_ref[...] = jnp.broadcast_to(b_ref[...], o_ref.shape).astype(o_ref.dtype)

    o_ref[...] += jnp.dot(
        x_ref[...], w_ref[...], preferred_element_type=jnp.float32
    )


@functools.partial(jax.jit, static_argnames=("tn", "tk"))
def pallas_linear(x, w, b, *, tn, tk):
    """y = x @ w + b with x:[B,K], w:[K,N] (bf16 weight stream), b:[N] f32."""
    B, K = x.shape
    Kw, N = w.shape
    assert K == Kw and b.shape == (N,)
    assert N % tn == 0 and K % tk == 0

    x = x.astype(w.dtype)                       # match MXU operand dtypes (bf16)
    b2 = b.astype(jnp.float32).reshape(1, N)
    grid = (N // tn, K // tk)

    return pl.pallas_call(
        _linear_kernel,
        out_shape=jax.ShapeDtypeStruct((B, N), jnp.float32),
        grid_spec=pltpu.PrefetchScalarGridSpec(
            num_scalar_prefetch=0,
            grid=grid,
            in_specs=[
                pl.BlockSpec((B, tk), lambda j, k: (0, k)),    # activation tile
                pl.BlockSpec((tk, tn), lambda j, k: (k, j)),   # weight tile
                pl.BlockSpec((1, tn), lambda j, k: (0, j)),    # bias tile
            ],
            out_specs=pl.BlockSpec((B, tn), lambda j, k: (0, j)),
        ),
        compiler_params=pltpu.CompilerParams(
            dimension_semantics=("parallel", "arbitrary"),
            vmem_limit_bytes=32 * 1024 * 1024,
        ),
    )(x, w, b2)


def init_params(key):
    """Deterministic init mirroring nn.Linear's U(-1/sqrt(in), 1/sqrt(in))."""
    k1, k2, k3, k4 = jax.random.split(key, 4)
    lim1 = 1.0 / (IN1 ** 0.5)
    lim2 = 1.0 / (IN2 ** 0.5)
    # Stored as [in, out] (transpose of PyTorch's [out, in]) so kernel does x @ W.
    return {
        "fc_w": jax.random.uniform(k1, (IN1, OUT1), jnp.float32, -lim1, lim1),
        "fc_b": jax.random.uniform(k2, (OUT1,), jnp.float32, -lim1, lim1),
        "fc1_w": jax.random.uniform(k3, (IN2, OUT2), jnp.float32, -lim2, lim2),
        "fc1_b": jax.random.uniform(k4, (OUT2,), jnp.float32, -lim2, lim2),
    }


def prepare_params(params, weight_dtype=jnp.bfloat16):
    """One-time weight prep (outside the per-call hot path):

    - zero-pad the 1000-wide intermediate to 1024 (fc_w cols, fc_b, fc1_w rows)
      so both layer-1 N and layer-2 K are 128-aligned (no masked partial lanes,
      and layer 1 splits into 2 parallel N tiles for v7x's two TensorCores);
    - cast the streamed weights to bf16 (halves HBM traffic; accumulation is f32).
    Padded fc_w columns and fc_b entries are exactly zero, so the padded h
    columns are zero and the padded fc1_w rows (also zero) contribute nothing.
    """
    pad1 = OUT1_PAD - OUT1
    return {
        "fc_w": jnp.pad(params["fc_w"], ((0, 0), (0, pad1))).astype(weight_dtype),
        "fc_b": jnp.pad(params["fc_b"], (0, pad1)).astype(jnp.float32),
        "fc1_w": jnp.pad(params["fc1_w"], ((0, pad1), (0, 0))).astype(weight_dtype),
        "fc1_b": params["fc1_b"].astype(jnp.float32),
    }


def reconstructor_forward(x, prepared):
    """Pallas implementation of Reconstructor.forward (bf16 weight stream)."""
    # fc: 4096 -> 1024 (padded); tn=512 -> grid (2, 4): 2 parallel N tiles.
    h = pallas_linear(x, prepared["fc_w"], prepared["fc_b"], tn=512, tk=1024)
    # fc1: 1024 (padded K) -> 48000; tn=3200 -> grid (15, 1), 6.4 MB bf16 W tiles.
    y = pallas_linear(h, prepared["fc1_w"], prepared["fc1_b"], tn=3200, tk=1024)
    # TODO(synk): optionally fuse both layers into one pallas_call (keep h in a
    # VMEM scratch) to hide the second pipeline fill; ~2-5% on top of the above.
    return y


if __name__ == "__main__":
    key = jax.random.PRNGKey(0)
    pkey, xkey = jax.random.split(key)

    params = init_params(pkey)
    prepared = prepare_params(params)

    B = 8  # small batch; feature dims fixed by the module (4096 -> 1000 -> 48000)
    x = jax.random.normal(xkey, (B, IN1), jnp.float32)

    y = reconstructor_forward(x, prepared)
    y = jax.block_until_ready(y)
    assert y.shape == (B, OUT2) and y.dtype == jnp.float32

    # Check 1: against a bf16-consistent JAX reference (same math as the kernel).
    xb = x.astype(jnp.bfloat16)
    h_ref = jnp.dot(xb, prepared["fc_w"], preferred_element_type=jnp.float32)
    h_ref = h_ref + prepared["fc_b"]
    ref_bf16 = jnp.dot(h_ref.astype(jnp.bfloat16), prepared["fc1_w"],
                       preferred_element_type=jnp.float32) + prepared["fc1_b"]
    err = float(jnp.max(jnp.abs(y - ref_bf16)))
    assert err < 1e-3, f"mismatch vs bf16 reference: {err}"

    # Check 2: against the full-f32 reference of the original module (documents
    # the precision change from streaming weights in bf16).
    ref_f32 = (x @ params["fc_w"] + params["fc_b"]) @ params["fc1_w"] + params["fc1_b"]
    err_f32 = float(jnp.max(jnp.abs(y - ref_f32)))
    assert err_f32 < 5e-2, f"mismatch vs f32 reference: {err_f32}"

    print("KERNEL_OK")
</pallas_src>

<mosaic_0001>
module attributes {stable_mosaic.version = 11 : i64} {
  func.func @_linear_kernel(%arg0: i32, %arg1: i32, %arg2: memref<8x1024xbf16, #tpu.memory_space<vmem>>, %arg3: memref<1024x512xbf16, #tpu.memory_space<vmem>>, %arg4: memref<1x512xf32, #tpu.memory_space<vmem>>, %arg5: memref<8x512xf32, #tpu.memory_space<vmem>>) attributes {dimension_semantics = [#tpu.dimension_semantics<parallel>, #tpu.dimension_semantics<arbitrary>], iteration_bounds = array<i64: 2, 4>, scalar_prefetch = 0 : i64, scratch_operands = 0 : i64, tpu.core_type = #tpu.core_type<tc>, window_params = [{transform_indices = @transform_0, window_bounds = array<i64: 8, 1024>}, {transform_indices = @transform_1, window_bounds = array<i64: 1024, 512>}, {transform_indices = @transform_2, window_bounds = array<i64: 1, 512>}, {transform_indices = @transform_3, window_bounds = array<i64: 8, 512>}]} {
    %c0_i32 = arith.constant 0 : i32
    %0 = arith.cmpi eq, %arg1, %c0_i32 : i32
    %1 = arith.extui %0 : i1 to i32
    %c0_i32_0 = arith.constant 0 : i32
    %2 = arith.cmpi ne, %1, %c0_i32_0 : i32
    scf.if %2 {
      %c0_8 = arith.constant 0 : index
      %c0_9 = arith.constant 0 : index
      %9 = vector.load %arg4[%c0_8, %c0_9] : memref<1x512xf32, #tpu.memory_space<vmem>>, vector<1x512xf32>
      %10 = vector.shape_cast %9 : vector<1x512xf32> to vector<1x512xf32>
      %11 = vector.broadcast %10 : vector<1x512xf32> to vector<8x512xf32>
      %c0_10 = arith.constant 0 : index
      %c0_11 = arith.constant 0 : index
      %12 = vector.load %arg5[%c0_10, %c0_11] : memref<8x512xf32, #tpu.memory_space<vmem>>, vector<8x512xf32>
      tpu.vector_store %arg5[%c0_10, %c0_11], %11 {strides = array<i32>} : memref<8x512xf32, #tpu.memory_space<vmem>>, vector<8x512xf32>,
    } else {
    }
    %c0 = arith.constant 0 : index
    %c0_1 = arith.constant 0 : index
    %3 = vector.load %arg5[%c0, %c0_1] : memref<8x512xf32, #tpu.memory_space<vmem>>, vector<8x512xf32>
    %c0_2 = arith.constant 0 : index
    %c0_3 = arith.constant 0 : index
    %4 = vector.load %arg2[%c0_2, %c0_3] : memref<8x1024xbf16, #tpu.memory_space<vmem>>, vector<8x1024xbf16>
    %c0_4 = arith.constant 0 : index
    %c0_5 = arith.constant 0 : index
    %5 = vector.load %arg3[%c0_4, %c0_5] : memref<1024x512xbf16, #tpu.memory_space<vmem>>, vector<1024x512xbf16>
    %cst = arith.constant dense<0.000000e+00> : vector<8x512xf32>
    %6 = tpu.matmul %4, %5, %cst {dimension_numbers = #tpu.dot_dimension_numbers<[1], [0], [0], [1], [0, 0, 1, 1], [], []>} : vector<8x1024xbf16>, vector<1024x512xbf16>, vector<8x512xf32> -> vector<8x512xf32>
    %7 = arith.addf %3, %6 : vector<8x512xf32>
    %c0_6 = arith.constant 0 : index
    %c0_7 = arith.constant 0 : index
    %8 = vector.load %arg5[%c0_6, %c0_7] : memref<8x512xf32, #tpu.memory_space<vmem>>, vector<8x512xf32>
    tpu.vector_store %arg5[%c0_6, %c0_7], %7 {strides = array<i32>} : memref<8x512xf32, #tpu.memory_space<vmem>>, vector<8x512xf32>,
    return
  }
  func.func @transform_0(%arg0: i32, %arg1: i32) -> (i32, i32) {
    %c0_i32 = arith.constant 0 : i32
    %c0_i32_0 = arith.constant 0 : i32
    return %c0_i32, %arg1 : i32, i32
  }
  func.func @transform_1(%arg0: i32, %arg1: i32) -> (i32, i32) {
    %c0_i32 = arith.constant 0 : i32
    return %arg1, %arg0 : i32, i32
  }
  func.func @transform_2(%arg0: i32, %arg1: i32) -> (i32, i32) {
    %c0_i32 = arith.constant 0 : i32
    %c0_i32_0 = arith.constant 0 : i32
    return %c0_i32, %arg0 : i32, i32
  }
  func.func @transform_3(%arg0: i32, %arg1: i32) -> (i32, i32) {
    %c0_i32 = arith.constant 0 : i32
    %c0_i32_0 = arith.constant 0 : i32
    return %c0_i32, %arg0 : i32, i32
  }
}

</mosaic_0001>

<bundles_post_ra>
// kernel: pallas_linear.1
= control target key start
LH: loop header
LB: loop body
LE: loop exit
PB: predicated region body
PF: predicated region fallthrough
CT: control target
= control target key end

     0   :  { %s3903_s0 = inlined_call_operand.vmem [shape: bf16[8,4096], index: 0, kind: input, shape index: {}]   ;;  %s3904_s1 = inlined_call_operand.hbm [shape: bf16[4096,1024], index: 1, kind: input, shape index: {}]   ;;  %s3905_s2 = inlined_call_operand.hbm [shape: f32[1,1024], index: 2, kind: input, shape index: {}]   ;;  %s3906_s3 = inlined_call_operand.hbm [shape: f32[8,1024], index: 3, kind: output, shape index: {}]  }
   0x1   :  { %3911 = sst [smem:[#allocation14_spill]] %s3904_s1 }
   0x2   :  { %8 = vsyncpa [#allocation3], 0 }
   0x3   :  { %10 = vsyncpa [#allocation3 + $0x1], 0 }
   0x4   :  { %11 = vsyncpa [#allocation6], 0 }
   0x5   :  { %13 = vsyncpa [#allocation6 + $0x1], 0 }
   0x6   :  { %14 = vsyncpa [#allocation4], 0 }
   0x7   :  { %16 = vsyncpa [#allocation4 + $0x1], 0  ;;  %s3343_s12 = smov 0   ;;  %s3345_s13 = smov 0  }
   0x8   :  { %s3347_s14 = smov 0   ;;  %s3349_s15 = smov 0  }
   0x9   :  { %s3351_s16 = smov 0   ;;  %s3353_s17 = smov 0  }
   0xa   :  { %s3355_s18 = smov 0   ;;  %s3357_s19 = smov 0  }
   0xb   :  { %s3359_s20 = smov 0   ;;  %s3361_s21 = smov 0  }
   0xc   :  { %s3363_s22 = smov 0  }
   0xd LB: > { %3912 = sst [smem:[#allocation11_spill]] %s3311_s21  ;;  %s31_s23 = sadd.s32 1, %s3307_s20  ;;  %s3315_s22 = sphi %s3363_s22, %s22_s22   ;;  %s3311_s21 = sphi %s3361_s21, %s3929_s21   ;;  %s3307_s20 = sphi %s3359_s20, %s3937_s20   ;;  %s3303_s19 = sphi %s3357_s19, %s3927_s19   ;;  %s3299_s18 = sphi %s3355_s18, %s3936_s18   ;;  %s3295_s17 = sphi %s3353_s17, %s3935_s17   ;;  %s3291_s16 = sphi %s3351_s16, %s3934_s16   ;;  %s3287_s15 = sphi %s3349_s15, %s3933_s15   ;;  %s3283_s14 = sphi %s3347_s14, %s3932_s14   ;;  %s3279_s13 = sphi %s3345_s13, %s3931_s13   ;;  %s3275_s12 = sphi %s3343_s12, %s3930_s12  }
   0xe   : > { %p3399_p0 = scmp.ge.s32.totalorder %s31_s23, 4  ;;  %p76_p1 = scmp.ne.s32.totalorder %s3295_s17, %s3291_s16 }
   0xf   : > { %p77_p2 = scmp.eq.s32.totalorder %s3315_s22, 0  ;;  %p2650_p4 = scmp.lt.s32.totalorder %s3315_s22, 8 }
  0x10   : > { %s3939_s23 = smov (%p3399_p0, %s31_s23), 0  ;;  %s167_s26 = sand.u32 1, %s3295_s17  }
  0x11   : > { %3914 = sst [smem:[#allocation12_spill]] %s3939_s23  ;;  %p78_p3 = por %p77_p2, %p76_p1 }
  0x12   : > { %s2346_s27 = sshll.u32 %s167_s26, 11  ;;  %s2348_s28 = sshll.u32 %s3311_s21, 2 }
  0x13   : > { %s2630_s29 = sshll.u32 %s3307_s20, 10  ;;  %s171_s30 = scalar_lea.vmem [#allocation2], %s2346_s27 }
  0x14   : > { %s181_s4 = sshll.u32 %s171_s30, 4  ;;  %s178_s5 = sadd.s32 %s2630_s29, %s2348_s28  ;;  %s182_s4 = int_to_ptr.vmem [resolvable:$true] %s181_s4 }
  0x15   : > { %s2350_s6 = sshll.u32 %s178_s5, 6  ;;  %p3419_p5 = pnand %p2650_p4, %p78_p3 }
  0x16   : > { %s3916_s1 = sld [smem:[#allocation14_spill]]  ;;  %p2354_p6 = scmp.ge.s32.totalorder %s3315_s22, 1 }
  0x17   : > { %s168_s11 = scalar_lea.sflag [#allocation3], %s167_s26  ;;  %p3137_p7 = pneg %p3419_p5 }
  0x18   : > { %s3148_s25 = scalar_lea.vmem %s182_s4, 32768  ;;  %s3317_s27 = smov [#allocation2]  }
  0x19   : > { %p3149_p8 = scmp.ne.s32.totalorder %s182_s4, %s3148_s25  ;;  %s3153_s28 = sshll.u32 %s3317_s27, 4  ;;  %s3154_s28 = int_to_ptr.vmem [resolvable:$false] %s3153_s28 }
  0x1a   : > { %s3155_s29 = scalar_lea.vmem %s3154_s28, 65536  ;;  %p3156_p11 = scmp.lt.s32.totalorder %s182_s4, %s3154_s28 }
  0x1b   : > { %p3151_p9 = pnand %p3149_p8, %p3137_p7  ;;  %p3157_p12 = scmp.lt.s32.totalorder %s3155_s29, %s3148_s25 }
  0x1c   : > { %s180_s10 = scalar_lea.hbm %s3916_s1, %s2350_s6 }
  0x1d   : > { %p3152_p10 = pneg %p3151_p9  ;;  %p3158_p13 = por %p3157_p12, %p3156_p11 }
  0x1f   : > { %p3159_p1 = pnand %p3158_p13, %p3152_p10 }
  0x21   : > { %3162 = shalt.err (!%p3159_p1)
}
  0x22   : > { %s3318_s30 = smov 512   ;;  %s3319_s25 = smov 256  }
  0x23   : > { %s3320_s26 = smov 16   ;;  %p208_p3 = scmp.lt.s32.totalorder %s3315_s22, 9 }
  0x24   : > { %2642 = dma.hbm_to_vmem [thread:$0]  (!%p3419_p5), %s180_s10, 32768, %s182_s4, %s168_s11, %s3318_s30, %s3319_s25, %s3320_s26  }
  0x25   : > { %p3434_p7 = pnand %p2354_p6, %p208_p3  ;;  %s64_s6 = ssub.s32 %s3307_s20, %s3939_s23 }
  0x26   : > { %s2342_s8 = sadd.s32 4294967295, %s3315_s22   ;;  %s34_s9 = sadd.s32 1, %s3311_s21 }
  0x27   : > { %p82_p8 = scmp.ne.s32.totalorder %s3291_s16, %s3287_s15  ;;  %s3941_s9 = smov (!%p3399_p0, %s34_s9), %s3311_s21 }
  0x28   : > { %s2343_s7 = sadd.s32 4294967294, %s3315_s22   ;;  %p83_p5 = scmp.eq.s32.totalorder %s2342_s8, 0 }
  0x29   : > { %p36_p9 = scmp.ge.s32.totalorder %s3941_s9, 2  ;;  %s95_s4 = sadd.s32 1, %s3283_s14 }
  0x2a   : > { %p3449_p10 = por %p83_p5, %p82_p8  ;;  %p108_p6 = scmp.ne.s32.totalorder %s3279_s13, %s3275_s12 }
  0x2b   : > { %s3943_s9 = smov (%p36_p9, %s3941_s9), 0  ;;  %p102_p0 = scmp.ne.s32.totalorder %s3283_s14, %s3279_s13 }
  0x2c   : > { %3919 = sst [smem:[#allocation13_spill]] %s3943_s9  ;;  %p3462_p11 = por %p108_p6, %p83_p5 }
  0x2d   : > { %s65_s24 = ssub.s32 %s3311_s21, %s3943_s9  ;;  %p132_p12 = scmp.eq.s32.totalorder %s2342_s8, 7 }
  0x2e   : > { %s66_s11 = sor.u32 %s65_s24, %s64_s6  ;;  %p93_p13 = scmp.eq.s32.totalorder %s65_s24, 0 }
  0x2f   : > { %p67_p1 = scmp.eq.s32.totalorder %s66_s11, 0  ;;  %p3468_p3 = por %p132_p12, %p102_p0 }
  0x30   : > { %s3473_s28 = scalar_select %p93_p13, %s3283_s14, %s95_s4  }
  0x31   : > { %s3921_s27 = scalar_select %p3468_p3, 1, 0 }
  0x32   : > { %s3922_s29 = sadd.s32 1, %s3295_s17  ;;  %p138_p8 = scmp.eq.s32.totalorder %s2343_s7, 7 }
  0x33   : > { %s3478_s30 = scalar_select %p67_p1, %s3295_s17, %s3922_s29  }
  0x34   : > { %s191_s25 = sand.u32 1, %s3283_s14   ;;  %p104_p5 = por %p102_p0, %p77_p2 }
  0x35   : > { %s2351_s26 = sshll.u32 %s191_s25, 2  ;;  %p3486_p9 = por %p138_p8, %p108_p6 }
  0x36   : > { %s2631_s8 = sshll.u32 %s3311_s21, 6  ;;  %s195_s24 = scalar_lea.vmem [#allocation5], %s2351_s26 }
  0x37   : > { %s3923_s6 = scalar_select %p3486_p9, 1, 0 }
  0x38   : > { %s203_s11 = sshll.u32 %s195_s24, 4  ;;  %s201_s4 = scalar_lea.hbm %s3905_s2, %s2631_s8  ;;  %s204_s11 = int_to_ptr.vmem [resolvable:$true] %s203_s11 }
  0x39   : > { %p3496_p12 = pnand %p2650_p4, %p104_p5  ;;  %s192_s29 = scalar_lea.sflag [#allocation6], %s191_s25 }
  0x3a   : > { %s3176_s23 = scalar_lea.vmem %s204_s11, 64  ;;  %s3321_s26 = smov [#allocation5]  }
  0x3b   : > { %p3165_p2 = pneg %p3496_p12  ;;  %p3177_p6 = scmp.ne.s32.totalorder %s204_s11, %s3176_s23 }
  0x3c   : > { %s3181_s24 = sshll.u32 %s3321_s26, 4  ;;  %s3182_s24 = int_to_ptr.vmem [resolvable:$false] %s3181_s24 }
  0x3d   : > { %p3179_p0 = pnand %p3177_p6, %p3165_p2  ;;  %s3183_s21 = scalar_lea.vmem %s3182_s24, 128 }
  0x3e   : > { %p3184_p1 = scmp.lt.s32.totalorder %s204_s11, %s3182_s24  ;;  %p3185_p8 = scmp.lt.s32.totalorder %s3183_s21, %s3176_s23 }
  0x3f   : > { %p3180_p13 = pneg %p3179_p0 }
  0x40   : > { %p3186_p9 = por %p3185_p8, %p3184_p1 }
  0x42   : > { %p3187_p3 = pnand %p3186_p9, %p3180_p13 }
  0x44   : > { %3190 = shalt.err (!%p3187_p3)
}
  0x45   : > { %2645 = dma.hbm_to_vmem [thread:$0]  (!%p3496_p12), %s201_s4, 64, %s204_s11, %s192_s29  }
  0x46   : > { %212 = sbr.rel (%p3434_p7) target bundleno = 570 (0x23a), region = 32  ;;  %s214_s1 = sand.u32 (!%p3434_p7), 1, %s3291_s16  }
  0x47   : > { %s2355_s9 = sshll.u32 (!%p3434_p7), %s214_s1, 11  ;;  %s215_s25 = scalar_lea.sflag (!%p3434_p7), [#allocation3], %s214_s1 }
  0x48   : > { %s3507_s8 = scalar_lea.vmem (!%p3434_p7), [#allocation2], %s2355_s9 }
  0x4b   : > { %3262 = dma.done.wait (%p3449_p10), %s215_s25, 32768  }
  0x4c   : > { %3264 = vsyncadd (%p3449_p10), %s215_s25, 4294934528  ;;  %s3514_s21 = sand.u32 1, %s3279_s13  }
  0x4d   : > { %s2356_s23 = sshll.u32 %s3514_s21, 2  ;;  %s224_s5 = scalar_lea.sflag [#allocation6], %s3514_s21 }
  0x4e   : > { %s227_s11 = scalar_lea.vmem [#allocation5], %s2356_s23 }
  0x4f   : > { %3266 = dma.done.wait (%p3462_p11), %s224_s5, 64  }
  0x50   : > { %3268 = vsyncadd (%p3462_p11), %s224_s5, 4294967232  ;;  %s2357_s4 = sshll.u32 %s3514_s21, 5  ;;  %s2358_s7 = sshll.u32 %s3299_s18, 3 }
  0x51   : > { %p261_p4 = scmp.lt.s32.totalorder %s2358_s7, 31  ;;  %s3529_s1 = scalar_lea.vmem [#allocation7], %s2357_s4 }
  0x52   : > { %p2360_p7 = scmp.ne.s32.totalorder %s3299_s18, 0 }
  0x53   : > { %s3945_s7 = smov (!%p261_p4, %s2358_s7), 31 }
  0x54   : > { %s2359_s10 = sshll.u32 %s3945_s7, 2  ;;  %273 = sbr.rel (%p2360_p7) target bundleno = 99 (0x63), region = 44 }
  0x55   : > { %s3527_s24 = scalar_lea.vmem %s3903_s0, %s2359_s10 }
  0x59   : > { %v276_v0 = vlaneseq  ;;  %v274_v2 = vld [vmem:[%s227_s11] sm:$0xf] }
  0x5b   : > { %v277_v1 = vshrl.u32 %v276_v0, 7 }
  0x5d   : > { %v278_v3 = vsub.s32 0, %v277_v1  ;;  %v282_v4 = vsub.s32 1, %v277_v1  ;;  %v286_v5 = vsub.s32 2, %v277_v1  ;;  %v290_v6 = vsub.s32 3, %v277_v1 }
  0x5f   : > { %v279_v7 = vrot.slane %v274_v2, %v278_v3  ;;  %v283_v8 = vrot.slane %v274_v2, %v282_v4  ;;  %v287_v9 = vrot.slane %v274_v2, %v286_v5  ;;  %v291_v10 = vrot.slane %v274_v2, %v290_v6 }
  0x61   : > { %296 = vst [vmem:[%s3529_s1] sm:$0xff] %v279_v7  ;;  %297 = vst [vmem:[%s3529_s1 + $0x8] sm:$0xff] %v283_v8 }
  0x62   : > { %298 = vst [vmem:[%s3529_s1 + $0x10] sm:$0xff] %v287_v9  ;;  %299 = vst [vmem:[%s3529_s1 + $0x18] sm:$0xff] %v291_v10 }
  0x63 PF: > { %v2743_v11 = vld [vmem:[%s3507_s8 + $0xe4] ss:$16 sps:$4 sm:$0xff]   ;;  %v2747_v13 = vld [vmem:[%s3507_s8 + $0xe0] ss:$16 sps:$4 sm:$0xff]   ;;  %v305_v59 = vld [vmem:[%s3527_s24 + $0x8] sm:$0xff]  ;;  %s2632_s18 = sshll.u32 %s3303_s19, 9 }
  0x64   : > { %v2745_v12 = vld [vmem:[%s3507_s8 + $0x2e4] ss:$16 sps:$4 sm:$0xff]   ;;  %1872 = vmatprep.subr.bf16.mxu0 %v2743_v11  ;;  %v2748_v14 = vld [vmem:[%s3507_s8 + $0x2e0] ss:$16 sps:$4 sm:$0xff]   ;;  %v3588_v62 = vcombine.high %v305_v59, %v305_v59  ;;  %s2223_s15 = sshll.u32 %s3529_s1, 4  ;;  %s2209_s23 = scalar_lea.sflag [#allocation4], %s3514_s21  ;;  %s2224_s15 = int_to_ptr.vmem [resolvable:$true] %s2223_s15 }
  0x65   : > { %1913 = vmatprep.subr.bf16.mxu1 %v2745_v12  ;;  %v2749_v15 = vld [vmem:[%s3507_s8 + $0xc4] ss:$16 sps:$4 sm:$0xff]   ;;  %1873 = vmatpush1.bf16.msra.mxu0 %v2747_v13  ;;  %v2753_v17 = vld [vmem:[%s3507_s8 + $0xc0] ss:$16 sps:$4 sm:$0xff]   ;;  %s3191_s5 = scalar_lea.vmem %s2224_s15, 512  ;;  %p3925_p11 = scmp.ne.s32.totalorder %s3921_s27, 0 }
  0x66   : > { %1914 = vmatpush1.bf16.msra.mxu1 %v2748_v14  ;;  %v2751_v16 = vld [vmem:[%s3507_s8 + $0x2c4] ss:$16 sps:$4 sm:$0xff]   ;;  %1874 = vmatprep.subr.bf16.mxu0 %v2749_v15  ;;  %v2754_v18 = vld [vmem:[%s3507_s8 + $0x2c0] ss:$16 sps:$4 sm:$0xff]   ;;  %p3192_p10 = scmp.ne.s32.totalorder %s2224_s15, %s3191_s5  ;;  %s3322_s19 = smov [#allocation7]  }
  0x67   : > { %1915 = vmatprep.subr.bf16.mxu1 %v2751_v16  ;;  %v2755_v19 = vld [vmem:[%s3507_s8 + $0xa4] ss:$16 sps:$4 sm:$0xff]   ;;  %v2759_v21 = vld [vmem:[%s3507_s8 + $0xa0] ss:$16 sps:$4 sm:$0xff]   ;;  %1945 = vmatprep.mubr.bf16.mxu1 %v3588_v62  ;;  %s3195_s11 = sshll.u32 %s3322_s19, 4  ;;  %s3196_s11 = int_to_ptr.vmem [resolvable:$false] %s3195_s11 }
  0x68   : > { %v2757_v20 = vld [vmem:[%s3507_s8 + $0x2a4] ss:$16 sps:$4 sm:$0xff]   ;;  %v2760_v22 = vld [vmem:[%s3507_s8 + $0x2a0] ss:$16 sps:$4 sm:$0xff]   ;;  %p3193_p3 = pnand %p3192_p10, %p3925_p11  ;;  %s3197_s4 = scalar_lea.vmem %s3196_s11, 1024 }
  0x69   : > { %1875 = vmatpush1.bf16.msra.mxu0 %v2753_v17  ;;  %v2761_v23 = vld [vmem:[%s3507_s8 + $0x84] ss:$16 sps:$4 sm:$0xff]   ;;  %v2765_v25 = vld [vmem:[%s3507_s8 + $0x80] ss:$16 sps:$4 sm:$0xff]   ;;  %p3198_p9 = scmp.lt.s32.totalorder %s2224_s15, %s3196_s11  ;;  %p3199_p12 = scmp.lt.s32.totalorder %s3197_s4, %s3191_s5 }
  0x6a   : > { %1916 = vmatpush1.bf16.msra.mxu1 %v2754_v18  ;;  %1876 = vmatprep.subr.bf16.mxu0 %v2755_v19  ;;  %v2763_v24 = vld [vmem:[%s3507_s8 + $0x284] ss:$16 sps:$4 sm:$0xff]   ;;  %v2766_v26 = vld [vmem:[%s3507_s8 + $0x280] ss:$16 sps:$4 sm:$0xff]   ;;  %v3612_v18 = vcombine.low %v305_v59, %v305_v59  ;;  %p3194_p5 = pneg %p3193_p3 }
  0x6b   : > { %1917 = vmatprep.subr.bf16.mxu1 %v2757_v20  ;;  %v2767_v27 = vld [vmem:[%s3507_s8 + $0x64] ss:$16 sps:$4 sm:$0xff]   ;;  %v2771_v29 = vld [vmem:[%s3507_s8 + $0x60] ss:$16 sps:$4 sm:$0xff]   ;;  %p3200_p2 = por %p3199_p12, %p3198_p9 }
  0x6c   : > { %v2769_v28 = vld [vmem:[%s3507_s8 + $0x264] ss:$16 sps:$4 sm:$0xff]   ;;  %v2772_v30 = vld [vmem:[%s3507_s8 + $0x260] ss:$16 sps:$4 sm:$0xff]  }
  0x6d   : > { %1877 = vmatpush1.bf16.msra.mxu0 %v2759_v21  ;;  %v2773_v31 = vld [vmem:[%s3507_s8 + $0x44] ss:$16 sps:$4 sm:$0xff]   ;;  %v2777_v33 = vld [vmem:[%s3507_s8 + $0x40] ss:$16 sps:$4 sm:$0xff]   ;;  %p3201_p6 = pnand %p3200_p2, %p3194_p5 }
  0x6e   : > { %1918 = vmatpush1.bf16.msra.mxu1 %v2760_v22  ;;  %1878 = vmatprep.subr.bf16.mxu0 %v2761_v23  ;;  %v2775_v32 = vld [vmem:[%s3507_s8 + $0x244] ss:$16 sps:$4 sm:$0xff]   ;;  %v2778_v34 = vld [vmem:[%s3507_s8 + $0x240] ss:$16 sps:$4 sm:$0xff]  }
  0x6f   : > { %1919 = vmatprep.subr.bf16.mxu1 %v2763_v24  ;;  %v2779_v35 = vld [vmem:[%s3507_s8 + $0x24] ss:$16 sps:$4 sm:$0xff]   ;;  %v2783_v37 = vld [vmem:[%s3507_s8 + $0x20] ss:$16 sps:$4 sm:$0xff]  }
  0x70   : > { %v2781_v36 = vld [vmem:[%s3507_s8 + $0x224] ss:$16 sps:$4 sm:$0xff]   ;;  %v2784_v38 = vld [vmem:[%s3507_s8 + $0x220] ss:$16 sps:$4 sm:$0xff]  }
  0x71   : > { %1879 = vmatpush1.bf16.msra.mxu0 %v2765_v25  ;;  %v2785_v39 = vld [vmem:[%s3507_s8 + $0x4] ss:$16 sps:$4 sm:$0xff]   ;;  %v2789_v41 = vld [vmem:[%s3507_s8] ss:$16 sps:$4 sm:$0xff]  }
  0x72   : > { %1920 = vmatpush1.bf16.msra.mxu1 %v2766_v26  ;;  %1880 = vmatprep.subr.bf16.mxu0 %v2767_v27  ;;  %v2787_v40 = vld [vmem:[%s3507_s8 + $0x204] ss:$16 sps:$4 sm:$0xff]   ;;  %v2790_v42 = vld [vmem:[%s3507_s8 + $0x200] ss:$16 sps:$4 sm:$0xff]  }
  0x73   : > { %1921 = vmatprep.subr.bf16.mxu1 %v2769_v28  ;;  %v2791_v43 = vld [vmem:[%s3507_s8 + $0x1e4] ss:$16 sps:$4 sm:$0xff]   ;;  %v2795_v45 = vld [vmem:[%s3507_s8 + $0x1e0] ss:$16 sps:$4 sm:$0xff]  }
  0x74   : > { %v2793_v44 = vld [vmem:[%s3507_s8 + $0x3e4] ss:$16 sps:$4 sm:$0xff]   ;;  %v2796_v46 = vld [vmem:[%s3507_s8 + $0x3e0] ss:$16 sps:$4 sm:$0xff]  }
  0x75   : > { %1881 = vmatpush1.bf16.msra.mxu0 %v2771_v29  ;;  %v2797_v47 = vld [vmem:[%s3507_s8 + $0x1c4] ss:$16 sps:$4 sm:$0xff]   ;;  %v2801_v49 = vld [vmem:[%s3507_s8 + $0x1c0] ss:$16 sps:$4 sm:$0xff]  }
  0x76   : > { %1922 = vmatpush1.bf16.msra.mxu1 %v2772_v30  ;;  %1882 = vmatprep.subr.bf16.mxu0 %v2773_v31  ;;  %v2799_v48 = vld [vmem:[%s3507_s8 + $0x3c4] ss:$16 sps:$4 sm:$0xff]   ;;  %v2802_v50 = vld [vmem:[%s3507_s8 + $0x3c0] ss:$16 sps:$4 sm:$0xff]  }
  0x77   : > { %1923 = vmatprep.subr.bf16.mxu1 %v2775_v32  ;;  %v2803_v51 = vld [vmem:[%s3507_s8 + $0x1a4] ss:$16 sps:$4 sm:$0xff]   ;;  %v2807_v53 = vld [vmem:[%s3507_s8 + $0x1a0] ss:$16 sps:$4 sm:$0xff]  }
  0x78   : > { %v2805_v52 = vld [vmem:[%s3507_s8 + $0x3a4] ss:$16 sps:$4 sm:$0xff]   ;;  %v2808_v54 = vld [vmem:[%s3507_s8 + $0x3a0] ss:$16 sps:$4 sm:$0xff]  }
  0x79   : > { %1883 = vmatpush1.bf16.msra.mxu0 %v2777_v33  ;;  %v2809_v55 = vld [vmem:[%s3507_s8 + $0x184] ss:$16 sps:$4 sm:$0xff]   ;;  %v2813_v60 = vld [vmem:[%s3507_s8 + $0x180] ss:$16 sps:$4 sm:$0xff]  }
  0x7a   : > { %1924 = vmatpush1.bf16.msra.mxu1 %v2778_v34  ;;  %1884 = vmatprep.subr.bf16.mxu0 %v2779_v35  ;;  %v2811_v56 = vld [vmem:[%s3507_s8 + $0x384] ss:$16 sps:$4 sm:$0xff]   ;;  %v2814_v61 = vld [vmem:[%s3507_s8 + $0x380] ss:$16 sps:$4 sm:$0xff]  }
  0x7b   : > { %1925 = vmatprep.subr.bf16.mxu1 %v2781_v36  ;;  %v304_v57 = vld [vmem:[%s3527_s24] sm:$0xff] }
  0x7c   : > { %v3583_v58 = vcombine.high %v304_v57, %v304_v57  ;;  %v2815_v63 = vld [vmem:[%s3507_s8 + $0x164] ss:$16 sps:$4 sm:$0xff]   ;;  %v2819_v1 = vld [vmem:[%s3507_s8 + $0x160] ss:$16 sps:$4 sm:$0xff]   ;;  %v3610_v17 = vcombine.low %v304_v57, %v304_v57 }
  0x7d   : > { %1885 = vmatpush1.bf16.msra.mxu0 %v2783_v37  ;;  %v2817_v0 = vld [vmem:[%s3507_s8 + $0x364] ss:$16 sps:$4 sm:$0xff]   ;;  %v2820_v2 = vld [vmem:[%s3507_s8 + $0x360] ss:$16 sps:$4 sm:$0xff]  }
  0x7e   : > { %1926 = vmatpush1.bf16.msra.mxu1 %v2784_v38  ;;  %1886 = vmatprep.subr.bf16.mxu0 %v2785_v39  ;;  %v2821_v3 = vld [vmem:[%s3507_s8 + $0x144] ss:$16 sps:$4 sm:$0xff]   ;;  %v2825_v5 = vld [vmem:[%s3507_s8 + $0x140] ss:$16 sps:$4 sm:$0xff]  }
  0x7f   : > { %1927 = vmatprep.subr.bf16.mxu1 %v2787_v40  ;;  %1904 = vmatprep.mubr.bf16.mxu0 %v3583_v58  ;;  %v2823_v4 = vld [vmem:[%s3507_s8 + $0x344] ss:$16 sps:$4 sm:$0xff]   ;;  %v2826_v6 = vld [vmem:[%s3507_s8 + $0x340] ss:$16 sps:$4 sm:$0xff]  }
  0x80   : > { %v2827_v7 = vld [vmem:[%s3507_s8 + $0x124] ss:$16 sps:$4 sm:$0xff]   ;;  %v2831_v9 = vld [vmem:[%s3507_s8 + $0x120] ss:$16 sps:$4 sm:$0xff]  }
  0x81   : > { %1887 = vmatpush1.bf16.msra.mxu0 %v2789_v41  ;;  %v2829_v8 = vld [vmem:[%s3507_s8 + $0x324] ss:$16 sps:$4 sm:$0xff]   ;;  %v2832_v10 = vld [vmem:[%s3507_s8 + $0x320] ss:$16 sps:$4 sm:$0xff]  }
  0x82   : > { %1928 = vmatpush1.bf16.msra.mxu1 %v2790_v42  ;;  %1888 = vmatprep.subr.bf16.mxu0 %v2791_v43  ;;  %v2833_v11 = vld [vmem:[%s3507_s8 + $0x104] ss:$16 sps:$4 sm:$0xff]   ;;  %v2837_v13 = vld [vmem:[%s3507_s8 + $0x100] ss:$16 sps:$4 sm:$0xff]  }
  0x83   : > { %1929 = vmatprep.subr.bf16.mxu1 %v2793_v44  ;;  %v2835_v12 = vld [vmem:[%s3507_s8 + $0x304] ss:$16 sps:$4 sm:$0xff]   ;;  %v2838_v14 = vld [vmem:[%s3507_s8 + $0x300] ss:$16 sps:$4 sm:$0xff]   ;;  %v3644_v44 = vld [vmem:[%s3527_s24 + $0x18] sm:$0xff] }
  0x84   : > { %v2845_v15 = vld [vmem:[%s3507_s8 + $0x4e4] ss:$16 sps:$4 sm:$0xff]   ;;  %v2843_v19 = vld [vmem:[%s3507_s8 + $0x4e0] ss:$16 sps:$4 sm:$0xff]  }
  0x85   : > { %1889 = vmatpush2.bf16.msra.mxu0 %v2795_v45  ;;  %v2848_v16 = vld [vmem:[%s3507_s8 + $0x6e4] ss:$16 sps:$4 sm:$0xff]   ;;  %v2846_v20 = vld [vmem:[%s3507_s8 + $0x6e0] ss:$16 sps:$4 sm:$0xff]  }
  0x86   : > { %1930 = vmatpush2.bf16.msra.mxu1 %v2796_v46  ;;  %1890 = vmatprep.subr.bf16.mxu0 %v2797_v47  ;;  %v2851_v21 = vld [vmem:[%s3507_s8 + $0x4c4] ss:$16 sps:$4 sm:$0xff]   ;;  %v2849_v23 = vld [vmem:[%s3507_s8 + $0x4c0] ss:$16 sps:$4 sm:$0xff]  }
  0x87   : > { %1931 = vmatprep.subr.bf16.mxu1 %v2799_v48  ;;  %v2854_v22 = vld [vmem:[%s3507_s8 + $0x6c4] ss:$16 sps:$4 sm:$0xff]   ;;  %v2852_v24 = vld [vmem:[%s3507_s8 + $0x6c0] ss:$16 sps:$4 sm:$0xff]   ;;  %v3654_v48 = vcombine.high %v3644_v44, %v3644_v44 }
  0x88   : > { %v2857_v25 = vld [vmem:[%s3507_s8 + $0x4a4] ss:$16 sps:$4 sm:$0xff]   ;;  %v2855_v27 = vld [vmem:[%s3507_s8 + $0x4a0] ss:$16 sps:$4 sm:$0xff]  }
  0x89   : > { %1891 = vmatpush2.bf16.msra.mxu0 %v2801_v49  ;;  %v2860_v26 = vld [vmem:[%s3507_s8 + $0x6a4] ss:$16 sps:$4 sm:$0xff]   ;;  %v2858_v28 = vld [vmem:[%s3507_s8 + $0x6a0] ss:$16 sps:$4 sm:$0xff]  }
  0x8a   : > { %1932 = vmatpush2.bf16.msra.mxu1 %v2802_v50  ;;  %1892 = vmatprep.subr.bf16.mxu0 %v2803_v51  ;;  %v2863_v29 = vld [vmem:[%s3507_s8 + $0x484] ss:$16 sps:$4 sm:$0xff]   ;;  %v2861_v31 = vld [vmem:[%s3507_s8 + $0x480] ss:$16 sps:$4 sm:$0xff]  }
  0x8b   : > { %1933 = vmatprep.subr.bf16.mxu1 %v2805_v52  ;;  %v2866_v30 = vld [vmem:[%s3507_s8 + $0x684] ss:$16 sps:$4 sm:$0xff]   ;;  %v2864_v32 = vld [vmem:[%s3507_s8 + $0x680] ss:$16 sps:$4 sm:$0xff]  }
  0x8c   : > { %v2869_v33 = vld [vmem:[%s3507_s8 + $0x464] ss:$16 sps:$4 sm:$0xff]   ;;  %v2867_v35 = vld [vmem:[%s3507_s8 + $0x460] ss:$16 sps:$4 sm:$0xff]  }
  0x8d   : > { %1893 = vmatpush2.bf16.msra.mxu0 %v2807_v53  ;;  %v2872_v34 = vld [vmem:[%s3507_s8 + $0x664] ss:$16 sps:$4 sm:$0xff]   ;;  %v2870_v36 = vld [vmem:[%s3507_s8 + $0x660] ss:$16 sps:$4 sm:$0xff]  }
  0x8e   : > { %1934 = vmatpush2.bf16.msra.mxu1 %v2808_v54  ;;  %1894 = vmatprep.subr.bf16.mxu0 %v2809_v55  ;;  %v2875_v37 = vld [vmem:[%s3507_s8 + $0x444] ss:$16 sps:$4 sm:$0xff]   ;;  %v2873_v39 = vld [vmem:[%s3507_s8 + $0x440] ss:$16 sps:$4 sm:$0xff]  }
  0x8f   : > { %1935 = vmatprep.subr.bf16.mxu1 %v2811_v56  ;;  %v2878_v38 = vld [vmem:[%s3507_s8 + $0x644] ss:$16 sps:$4 sm:$0xff]   ;;  %v2876_v40 = vld [vmem:[%s3507_s8 + $0x640] ss:$16 sps:$4 sm:$0xff]  }
  0x90   : > { %v2881_v41 = vld [vmem:[%s3507_s8 + $0x424] ss:$16 sps:$4 sm:$0xff]   ;;  %v2879_v45 = vld [vmem:[%s3507_s8 + $0x420] ss:$16 sps:$4 sm:$0xff]  }
  0x91   : > { %1895 = vmatpush2.bf16.msra.mxu0 %v2813_v60  ;;  %v2884_v42 = vld [vmem:[%s3507_s8 + $0x624] ss:$16 sps:$4 sm:$0xff]   ;;  %v2882_v46 = vld [vmem:[%s3507_s8 + $0x620] ss:$16 sps:$4 sm:$0xff]  }
  0x92   : > { %1936 = vmatpush2.bf16.msra.mxu1 %v2814_v61  ;;  %1896 = vmatprep.subr.bf16.mxu0 %v2815_v63  ;;  %v3641_v43 = vld [vmem:[%s3527_s24 + $0x10] sm:$0xff] }
  0x93   : > { %1937 = vmatprep.subr.bf16.mxu1 %v2817_v0  ;;  %v3650_v47 = vcombine.high %v3641_v43, %v3641_v43  ;;  %v2887_v49 = vld [vmem:[%s3507_s8 + $0x404] ss:$16 sps:$4 sm:$0xff]   ;;  %v2885_v51 = vld [vmem:[%s3507_s8 + $0x400] ss:$16 sps:$4 sm:$0xff]  }
  0x94   : > { %v2890_v50 = vld [vmem:[%s3507_s8 + $0x604] ss:$16 sps:$4 sm:$0xff]   ;;  %v2888_v52 = vld [vmem:[%s3507_s8 + $0x600] ss:$16 sps:$4 sm:$0xff]  }
  0x95   : > { %1897 = vmatpush2.bf16.msra.mxu0 %v2819_v1  ;;  %v2893_v53 = vld [vmem:[%s3507_s8 + $0x5e4] ss:$16 sps:$4 sm:$0xff]   ;;  %v2891_v55 = vld [vmem:[%s3507_s8 + $0x5e0] ss:$16 sps:$4 sm:$0xff]  }
  0x96   : > { %1938 = vmatpush2.bf16.msra.mxu1 %v2820_v2  ;;  %1898 = vmatprep.subr.bf16.mxu0 %v2821_v3  ;;  %v2896_v54 = vld [vmem:[%s3507_s8 + $0x7e4] ss:$16 sps:$4 sm:$0xff]   ;;  %v2894_v56 = vld [vmem:[%s3507_s8 + $0x7e0] ss:$16 sps:$4 sm:$0xff]  }
  0x97   : > { %1939 = vmatprep.subr.bf16.mxu1 %v2823_v4  ;;  %v2899_v57 = vld [vmem:[%s3507_s8 + $0x5c4] ss:$16 sps:$4 sm:$0xff]   ;;  %v2897_v60 = vld [vmem:[%s3507_s8 + $0x5c0] ss:$16 sps:$4 sm:$0xff]  }
  0x98   : > { %v2902_v59 = vld [vmem:[%s3507_s8 + $0x7c4] ss:$16 sps:$4 sm:$0xff]   ;;  %v2900_v61 = vld [vmem:[%s3507_s8 + $0x7c0] ss:$16 sps:$4 sm:$0xff]  }
  0x99   : > { %1899 = vmatpush2.bf16.msra.mxu0 %v2825_v5  ;;  %v2905_v63 = vld [vmem:[%s3507_s8 + $0x5a4] ss:$16 sps:$4 sm:$0xff]   ;;  %v2903_v1 = vld [vmem:[%s3507_s8 + $0x5a0] ss:$16 sps:$4 sm:$0xff]  }
  0x9a   : > { %1940 = vmatpush2.bf16.msra.mxu1 %v2826_v6  ;;  %1900 = vmatprep.subr.bf16.mxu0 %v2827_v7  ;;  %v2908_v0 = vld [vmem:[%s3507_s8 + $0x7a4] ss:$16 sps:$4 sm:$0xff]   ;;  %v2906_v2 = vld [vmem:[%s3507_s8 + $0x7a0] ss:$16 sps:$4 sm:$0xff]  }
  0x9b   : > { %1941 = vmatprep.subr.bf16.mxu1 %v2829_v8  ;;  %v2911_v3 = vld [vmem:[%s3507_s8 + $0x584] ss:$16 sps:$4 sm:$0xff]   ;;  %v2909_v5 = vld [vmem:[%s3507_s8 + $0x580] ss:$16 sps:$4 sm:$0xff]  }
  0x9c   : > { %v2914_v4 = vld [vmem:[%s3507_s8 + $0x784] ss:$16 sps:$4 sm:$0xff]   ;;  %v2912_v6 = vld [vmem:[%s3507_s8 + $0x780] ss:$16 sps:$4 sm:$0xff]  }
  0x9d   : > { %1901 = vmatpush2.bf16.msra.mxu0 %v2831_v9  ;;  %v2917_v7 = vld [vmem:[%s3507_s8 + $0x564] ss:$16 sps:$4 sm:$0xff]   ;;  %v2915_v9 = vld [vmem:[%s3507_s8 + $0x560] ss:$16 sps:$4 sm:$0xff]  }
  0x9e   : > { %1942 = vmatpush2.bf16.msra.mxu1 %v2832_v10  ;;  %1902 = vmatprep.subr.bf16.mxu0 %v2833_v11  ;;  %v2920_v8 = vld [vmem:[%s3507_s8 + $0x764] ss:$16 sps:$4 sm:$0xff]   ;;  %v2918_v10 = vld [vmem:[%s3507_s8 + $0x760] ss:$16 sps:$4 sm:$0xff]  }
  0x9f   : > { %1943 = vmatprep.subr.bf16.mxu1 %v2835_v12  ;;  %v2923_v11 = vld [vmem:[%s3507_s8 + $0x544] ss:$16 sps:$4 sm:$0xff]  }
  0xa0   : > { %v2926_v12 = vld [vmem:[%s3507_s8 + $0x744] ss:$16 sps:$4 sm:$0xff]  }
  0xa1   : > { %1903 = vmatpush2.bf16.msra.mxu0 %v2837_v13  ;;  %v2921_v13 = vld [vmem:[%s3507_s8 + $0x540] ss:$16 sps:$4 sm:$0xff]  }
  0xa2   : > { %1944 = vmatpush2.bf16.msra.mxu1 %v2838_v14  ;;  %1954 = vmatprep.subr.bf16.mxu0 %v2845_v15  ;;  %v2924_v14 = vld [vmem:[%s3507_s8 + $0x740] ss:$16 sps:$4 sm:$0xff]   ;;  %v2929_v15 = vld [vmem:[%s3507_s8 + $0x524] ss:$16 sps:$4 sm:$0xff]  }
  0xa3   : > { %1995 = vmatprep.subr.bf16.mxu1 %v2848_v16  ;;  %v2932_v16 = vld [vmem:[%s3507_s8 + $0x724] ss:$16 sps:$4 sm:$0xff]  }
  0xa4   : > { %1905 = vmatmul.mubr.bf16.vlgmr.msra.gmra.mxu0 %v3610_v17 }
  0xa5   : > { %1946 = vmatmul.mubr.bf16.vlgmr.msra.gmra.mxu1 %v3612_v18  ;;  %1955 = vmatpush1.bf16.msra.mxu0 %v2843_v19  ;;  %v2927_v19 = vld [vmem:[%s3507_s8 + $0x520] ss:$16 sps:$4 sm:$0xff]  }
  0xa6   : > { %1996 = vmatpush1.bf16.msra.mxu1 %v2846_v20  ;;  %1956 = vmatprep.subr.bf16.mxu0 %v2851_v21  ;;  %v2930_v20 = vld [vmem:[%s3507_s8 + $0x720] ss:$16 sps:$4 sm:$0xff]   ;;  %v2935_v21 = vld [vmem:[%s3507_s8 + $0x504] ss:$16 sps:$4 sm:$0xff]  }
  0xa7   : > { %1997 = vmatprep.subr.bf16.mxu1 %v2854_v22  ;;  %1986 = vmatprep.mubr.bf16.mxu0 %v3650_v47  ;;  %v2938_v22 = vld [vmem:[%s3507_s8 + $0x704] ss:$16 sps:$4 sm:$0xff]  }
  0xa8   : > { %2027 = vmatprep.mubr.bf16.mxu1 %v3654_v48 }
  0xa9   : > { %1957 = vmatpush1.bf16.msra.mxu0 %v2849_v23  ;;  %v2933_v23 = vld [vmem:[%s3507_s8 + $0x500] ss:$16 sps:$4 sm:$0xff]  }
  0xaa   : > { %1998 = vmatpush1.bf16.msra.mxu1 %v2852_v24  ;;  %1958 = vmatprep.subr.bf16.mxu0 %v2857_v25  ;;  %v2936_v24 = vld [vmem:[%s3507_s8 + $0x700] ss:$16 sps:$4 sm:$0xff]   ;;  %v2945_v25 = vld [vmem:[%s3507_s8 + $0xec] ss:$16 sps:$4 sm:$0xff]  }
  0xab   : > { %1999 = vmatprep.subr.bf16.mxu1 %v2860_v26  ;;  %v2948_v26 = vld [vmem:[%s3507_s8 + $0x2ec] ss:$16 sps:$4 sm:$0xff]  }
  0xad   : > { %1959 = vmatpush1.bf16.msra.mxu0 %v2855_v27  ;;  %v3698_v27 = vcombine.low %v3641_v43, %v3641_v43  ;;  %v2967_v43 = vld [vmem:[%s3507_s8 + $0x68] ss:$16 sps:$4 sm:$0xff]  }
  0xae   : > { %2000 = vmatpush1.bf16.msra.mxu1 %v2858_v28  ;;  %1960 = vmatprep.subr.bf16.mxu0 %v2863_v29  ;;  %v3702_v28 = vcombine.low %v3644_v44, %v3644_v44  ;;  %v2943_v29 = vld [vmem:[%s3507_s8 + $0xe8] ss:$16 sps:$4 sm:$0xff]  }
  0xaf   : > { %2001 = vmatprep.subr.bf16.mxu1 %v2866_v30  ;;  %v2946_v30 = vld [vmem:[%s3507_s8 + $0x2e8] ss:$16 sps:$4 sm:$0xff]  }
  0xb0   : > { %v2970_v44 = vld [vmem:[%s3507_s8 + $0x268] ss:$16 sps:$4 sm:$0xff]  }
  0xb1   : > { %1961 = vmatpush1.bf16.msra.mxu0 %v2861_v31  ;;  %v2951_v31 = vld [vmem:[%s3507_s8 + $0xcc] ss:$16 sps:$4 sm:$0xff]  }
  0xb2   : > { %2002 = vmatpush1.bf16.msra.mxu1 %v2864_v32  ;;  %1962 = vmatprep.subr.bf16.mxu0 %v2869_v33  ;;  %v2954_v32 = vld [vmem:[%s3507_s8 + $0x2cc] ss:$16 sps:$4 sm:$0xff]   ;;  %v2949_v33 = vld [vmem:[%s3507_s8 + $0xc8] ss:$16 sps:$4 sm:$0xff]  }
  0xb3   : > { %2003 = vmatprep.subr.bf16.mxu1 %v2872_v34  ;;  %v2952_v34 = vld [vmem:[%s3507_s8 + $0x2c8] ss:$16 sps:$4 sm:$0xff]  }
  0xb5   : > { %1963 = vmatpush1.bf16.msra.mxu0 %v2867_v35  ;;  %v2957_v35 = vld [vmem:[%s3507_s8 + $0xac] ss:$16 sps:$4 sm:$0xff]  }
  0xb6   : > { %2004 = vmatpush1.bf16.msra.mxu1 %v2870_v36  ;;  %1964 = vmatprep.subr.bf16.mxu0 %v2875_v37  ;;  %v2960_v36 = vld [vmem:[%s3507_s8 + $0x2ac] ss:$16 sps:$4 sm:$0xff]   ;;  %v2955_v37 = vld [vmem:[%s3507_s8 + $0xa8] ss:$16 sps:$4 sm:$0xff]  }
  0xb7   : > { %2005 = vmatprep.subr.bf16.mxu1 %v2878_v38  ;;  %v2958_v38 = vld [vmem:[%s3507_s8 + $0x2a8] ss:$16 sps:$4 sm:$0xff]  }
  0xb9   : > { %1965 = vmatpush1.bf16.msra.mxu0 %v2873_v39  ;;  %v2963_v39 = vld [vmem:[%s3507_s8 + $0x8c] ss:$16 sps:$4 sm:$0xff]  }
  0xba   : > { %2006 = vmatpush1.bf16.msra.mxu1 %v2876_v40  ;;  %1966 = vmatprep.subr.bf16.mxu0 %v2881_v41  ;;  %v2966_v40 = vld [vmem:[%s3507_s8 + $0x28c] ss:$16 sps:$4 sm:$0xff]   ;;  %v2961_v41 = vld [vmem:[%s3507_s8 + $0x88] ss:$16 sps:$4 sm:$0xff]  }
  0xbb   : > { %2007 = vmatprep.subr.bf16.mxu1 %v2884_v42  ;;  %v2964_v42 = vld [vmem:[%s3507_s8 + $0x288] ss:$16 sps:$4 sm:$0xff]  }
  0xbd   : > { %1967 = vmatpush1.bf16.msra.mxu0 %v2879_v45  ;;  %v2975_v45 = vld [vmem:[%s3507_s8 + $0x4c] ss:$16 sps:$4 sm:$0xff]  }
  0xbe   : > { %2008 = vmatpush1.bf16.msra.mxu1 %v2882_v46  ;;  %1968 = vmatprep.subr.bf16.mxu0 %v2887_v49  ;;  %v2978_v46 = vld [vmem:[%s3507_s8 + $0x24c] ss:$16 sps:$4 sm:$0xff]   ;;  %v2973_v49 = vld [vmem:[%s3507_s8 + $0x48] ss:$16 sps:$4 sm:$0xff]  }
  0xbf   : > { %2009 = vmatprep.subr.bf16.mxu1 %v2890_v50  ;;  %v2976_v50 = vld [vmem:[%s3507_s8 + $0x248] ss:$16 sps:$4 sm:$0xff]  }
  0xc1   : > { %1969 = vmatpush1.bf16.msra.mxu0 %v2885_v51  ;;  %v2981_v51 = vld [vmem:[%s3507_s8 + $0x2c] ss:$16 sps:$4 sm:$0xff]  }
  0xc2   : > { %2010 = vmatpush1.bf16.msra.mxu1 %v2888_v52  ;;  %1970 = vmatprep.subr.bf16.mxu0 %v2893_v53  ;;  %v2984_v52 = vld [vmem:[%s3507_s8 + $0x22c] ss:$16 sps:$4 sm:$0xff]   ;;  %v2979_v53 = vld [vmem:[%s3507_s8 + $0x28] ss:$16 sps:$4 sm:$0xff]  }
  0xc3   : > { %2011 = vmatprep.subr.bf16.mxu1 %v2896_v54  ;;  %v2982_v54 = vld [vmem:[%s3507_s8 + $0x228] ss:$16 sps:$4 sm:$0xff]  }
  0xc5   : > { %1971 = vmatpush2.bf16.msra.mxu0 %v2891_v55  ;;  %v2987_v55 = vld [vmem:[%s3507_s8 + $0xc] ss:$16 sps:$4 sm:$0xff]  }
  0xc6   : > { %2012 = vmatpush2.bf16.msra.mxu1 %v2894_v56  ;;  %1972 = vmatprep.subr.bf16.mxu0 %v2899_v57  ;;  %v2990_v56 = vld [vmem:[%s3507_s8 + $0x20c] ss:$16 sps:$4 sm:$0xff]   ;;  %v2985_v57 = vld [vmem:[%s3507_s8 + $0x8] ss:$16 sps:$4 sm:$0xff]  }
  0xc7   : > { %2013 = vmatprep.subr.bf16.mxu1 %v2902_v59  ;;  %v2988_v59 = vld [vmem:[%s3507_s8 + $0x208] ss:$16 sps:$4 sm:$0xff]  }
  0xc9   : > { %1973 = vmatpush2.bf16.msra.mxu0 %v2897_v60  ;;  %v2993_v60 = vld [vmem:[%s3507_s8 + $0x1ec] ss:$16 sps:$4 sm:$0xff]  }
  0xca   : > { %2014 = vmatpush2.bf16.msra.mxu1 %v2900_v61  ;;  %1974 = vmatprep.subr.bf16.mxu0 %v2905_v63  ;;  %v2996_v61 = vld [vmem:[%s3507_s8 + $0x3ec] ss:$16 sps:$4 sm:$0xff]   ;;  %v2991_v63 = vld [vmem:[%s3507_s8 + $0x1e8] ss:$16 sps:$4 sm:$0xff]  }
  0xcb   : > { %2015 = vmatprep.subr.bf16.mxu1 %v2908_v0  ;;  %v2994_v0 = vld [vmem:[%s3507_s8 + $0x3e8] ss:$16 sps:$4 sm:$0xff]  }
  0xcd   : > { %1975 = vmatpush2.bf16.msra.mxu0 %v2903_v1  ;;  %v2999_v1 = vld [vmem:[%s3507_s8 + $0x1cc] ss:$16 sps:$4 sm:$0xff]  }
  0xce   : > { %2016 = vmatpush2.bf16.msra.mxu1 %v2906_v2  ;;  %1976 = vmatprep.subr.bf16.mxu0 %v2911_v3  ;;  %v3002_v2 = vld [vmem:[%s3507_s8 + $0x3cc] ss:$16 sps:$4 sm:$0xff]   ;;  %v2997_v3 = vld [vmem:[%s3507_s8 + $0x1c8] ss:$16 sps:$4 sm:$0xff]  }
  0xcf   : > { %2017 = vmatprep.subr.bf16.mxu1 %v2914_v4  ;;  %v3000_v4 = vld [vmem:[%s3507_s8 + $0x3c8] ss:$16 sps:$4 sm:$0xff]  }
  0xd1   : > { %1977 = vmatpush2.bf16.msra.mxu0 %v2909_v5  ;;  %v3005_v5 = vld [vmem:[%s3507_s8 + $0x1ac] ss:$16 sps:$4 sm:$0xff]  }
  0xd2   : > { %2018 = vmatpush2.bf16.msra.mxu1 %v2912_v6  ;;  %1978 = vmatprep.subr.bf16.mxu0 %v2917_v7  ;;  %v3008_v6 = vld [vmem:[%s3507_s8 + $0x3ac] ss:$16 sps:$4 sm:$0xff]   ;;  %v3003_v7 = vld [vmem:[%s3507_s8 + $0x1a8] ss:$16 sps:$4 sm:$0xff]  }
  0xd3   : > { %2019 = vmatprep.subr.bf16.mxu1 %v2920_v8  ;;  %v3006_v8 = vld [vmem:[%s3507_s8 + $0x3a8] ss:$16 sps:$4 sm:$0xff]  }
  0xd5   : > { %1979 = vmatpush2.bf16.msra.mxu0 %v2915_v9  ;;  %v3011_v9 = vld [vmem:[%s3507_s8 + $0x18c] ss:$16 sps:$4 sm:$0xff]  }
  0xd6   : > { %2020 = vmatpush2.bf16.msra.mxu1 %v2918_v10  ;;  %1980 = vmatprep.subr.bf16.mxu0 %v2923_v11  ;;  %v3014_v10 = vld [vmem:[%s3507_s8 + $0x38c] ss:$16 sps:$4 sm:$0xff]   ;;  %v3009_v11 = vld [vmem:[%s3507_s8 + $0x188] ss:$16 sps:$4 sm:$0xff]  }
  0xd7   : > { %2021 = vmatprep.subr.bf16.mxu1 %v2926_v12  ;;  %v3012_v12 = vld [vmem:[%s3507_s8 + $0x388] ss:$16 sps:$4 sm:$0xff]  }
  0xd9   : > { %1981 = vmatpush2.bf16.msra.mxu0 %v2921_v13  ;;  %v3017_v13 = vld [vmem:[%s3507_s8 + $0x16c] ss:$16 sps:$4 sm:$0xff]  }
  0xda   : > { %2022 = vmatpush2.bf16.msra.mxu1 %v2924_v14  ;;  %1982 = vmatprep.subr.bf16.mxu0 %v2929_v15  ;;  %v3020_v14 = vld [vmem:[%s3507_s8 + $0x36c] ss:$16 sps:$4 sm:$0xff]   ;;  %v3015_v15 = vld [vmem:[%s3507_s8 + $0x168] ss:$16 sps:$4 sm:$0xff]  }
  0xdb   : > { %2023 = vmatprep.subr.bf16.mxu1 %v2932_v16  ;;  %v3018_v16 = vld [vmem:[%s3507_s8 + $0x368] ss:$16 sps:$4 sm:$0xff]  }
  0xdd   : > { %1983 = vmatpush2.bf16.msra.mxu0 %v2927_v19  ;;  %v3023_v19 = vld [vmem:[%s3507_s8 + $0x14c] ss:$16 sps:$4 sm:$0xff]  }
  0xde   : > { %2024 = vmatpush2.bf16.msra.mxu1 %v2930_v20  ;;  %1984 = vmatprep.subr.bf16.mxu0 %v2935_v21  ;;  %v3026_v20 = vld [vmem:[%s3507_s8 + $0x34c] ss:$16 sps:$4 sm:$0xff]   ;;  %v3021_v21 = vld [vmem:[%s3507_s8 + $0x148] ss:$16 sps:$4 sm:$0xff]  }
  0xdf   : > { %2025 = vmatprep.subr.bf16.mxu1 %v2938_v22  ;;  %v3024_v22 = vld [vmem:[%s3507_s8 + $0x348] ss:$16 sps:$4 sm:$0xff]  }
  0xe1   : > { %1985 = vmatpush2.bf16.msra.mxu0 %v2933_v23  ;;  %v3029_v23 = vld [vmem:[%s3507_s8 + $0x12c] ss:$16 sps:$4 sm:$0xff]  }
  0xe2   : > { %2026 = vmatpush2.bf16.msra.mxu1 %v2936_v24  ;;  %2036 = vmatprep.subr.bf16.mxu0 %v2945_v25  ;;  %v3032_v24 = vld [vmem:[%s3507_s8 + $0x32c] ss:$16 sps:$4 sm:$0xff]   ;;  %v3027_v25 = vld [vmem:[%s3507_s8 + $0x128] ss:$16 sps:$4 sm:$0xff]  }
  0xe3   : > { %2077 = vmatprep.subr.bf16.mxu1 %v2948_v26  ;;  %v3030_v26 = vld [vmem:[%s3507_s8 + $0x328] ss:$16 sps:$4 sm:$0xff]  }
  0xe4   : > { %1987 = vmatmul.mubr.bf16.vlgmr.msra.gmra.mxu0 %v3698_v27 }
  0xe5   : > { %2028 = vmatmul.mubr.bf16.vlgmr.msra.gmra.mxu1 %v3702_v28  ;;  %2037 = vmatpush1.bf16.msra.mxu0 %v2943_v29  ;;  %v3035_v29 = vld [vmem:[%s3507_s8 + $0x10c] ss:$16 sps:$4 sm:$0xff]  }
  0xe6   : > { %2078 = vmatpush1.bf16.msra.mxu1 %v2946_v30  ;;  %2038 = vmatprep.subr.bf16.mxu0 %v2951_v31  ;;  %v3038_v30 = vld [vmem:[%s3507_s8 + $0x30c] ss:$16 sps:$4 sm:$0xff]   ;;  %v3033_v31 = vld [vmem:[%s3507_s8 + $0x108] ss:$16 sps:$4 sm:$0xff]  }
  0xe7   : > { %2079 = vmatprep.subr.bf16.mxu1 %v2954_v32  ;;  %2068 = vmatprep.mubr.bf16.mxu0 %v3583_v58  ;;  %v2969_v58 = vld [vmem:[%s3507_s8 + $0x6c] ss:$16 sps:$4 sm:$0xff]   ;;  %v3036_v32 = vld [vmem:[%s3507_s8 + $0x308] ss:$16 sps:$4 sm:$0xff]  }
  0xe8   : > { %2109 = vmatprep.mubr.bf16.mxu1 %v3588_v62  ;;  %v2972_v62 = vld [vmem:[%s3507_s8 + $0x26c] ss:$16 sps:$4 sm:$0xff]  }
  0xe9   : > { %2039 = vmatpush1.bf16.msra.mxu0 %v2949_v33  ;;  %v3041_v33 = vld [vmem:[%s3507_s8 + $0x4ec] ss:$16 sps:$4 sm:$0xff]  }
  0xea   : > { %2080 = vmatpush1.bf16.msra.mxu1 %v2952_v34  ;;  %2040 = vmatprep.subr.bf16.mxu0 %v2957_v35  ;;  %v3044_v34 = vld [vmem:[%s3507_s8 + $0x6ec] ss:$16 sps:$4 sm:$0xff]   ;;  %v3039_v35 = vld [vmem:[%s3507_s8 + $0x4e8] ss:$16 sps:$4 sm:$0xff]  }
  0xeb   : > { %2081 = vmatprep.subr.bf16.mxu1 %v2960_v36  ;;  %v3042_v36 = vld [vmem:[%s3507_s8 + $0x6e8] ss:$16 sps:$4 sm:$0xff]  }
  0xed   : > { %2041 = vmatpush1.bf16.msra.mxu0 %v2955_v37  ;;  %v3047_v37 = vld [vmem:[%s3507_s8 + $0x4cc] ss:$16 sps:$4 sm:$0xff]  }
  0xee   : > { %2082 = vmatpush1.bf16.msra.mxu1 %v2958_v38  ;;  %2042 = vmatprep.subr.bf16.mxu0 %v2963_v39  ;;  %v3050_v38 = vld [vmem:[%s3507_s8 + $0x6cc] ss:$16 sps:$4 sm:$0xff]   ;;  %v3045_v39 = vld [vmem:[%s3507_s8 + $0x4c8] ss:$16 sps:$4 sm:$0xff]  }
  0xef   : > { %2083 = vmatprep.subr.bf16.mxu1 %v2966_v40  ;;  %v3048_v40 = vld [vmem:[%s3507_s8 + $0x6c8] ss:$16 sps:$4 sm:$0xff]  }
  0xf1   : > { %2043 = vmatpush1.bf16.msra.mxu0 %v2961_v41  ;;  %v3053_v41 = vld [vmem:[%s3507_s8 + $0x4ac] ss:$16 sps:$4 sm:$0xff]  }
  0xf2   : > { %2084 = vmatpush1.bf16.msra.mxu1 %v2964_v42  ;;  %2044 = vmatprep.subr.bf16.mxu0 %v2969_v58  ;;  %v3056_v42 = vld [vmem:[%s3507_s8 + $0x6ac] ss:$16 sps:$4 sm:$0xff]  }
  0xf3   : > { %2085 = vmatprep.subr.bf16.mxu1 %v2972_v62  ;;  %v3059_v58 = vld [vmem:[%s3507_s8 + $0x48c] ss:$16 sps:$4 sm:$0xff]  }
  0xf4   : > { %v3062_v62 = vld [vmem:[%s3507_s8 + $0x68c] ss:$16 sps:$4 sm:$0xff]  }
  0xf5   : > { %2045 = vmatpush1.bf16.msra.mxu0 %v2967_v43  ;;  %v3057_v43 = vld [vmem:[%s3507_s8 + $0x488] ss:$16 sps:$4 sm:$0xff]  }
  0xf6   : > { %2086 = vmatpush1.bf16.msra.mxu1 %v2970_v44  ;;  %2046 = vmatprep.subr.bf16.mxu0 %v2975_v45  ;;  %v3068_v44 = vld [vmem:[%s3507_s8 + $0x66c] ss:$16 sps:$4 sm:$0xff]   ;;  %v3063_v45 = vld [vmem:[%s3507_s8 + $0x468] ss:$16 sps:$4 sm:$0xff]  }
  0xf7   : > { %2087 = vmatprep.subr.bf16.mxu1 %v2978_v46  ;;  %v3066_v46 = vld [vmem:[%s3507_s8 + $0x668] ss:$16 sps:$4 sm:$0xff]  }
  0xf9   : > { %2047 = vmatpush1.bf16.msra.mxu0 %v2973_v49  ;;  %v3071_v49 = vld [vmem:[%s3507_s8 + $0x44c] ss:$16 sps:$4 sm:$0xff]  }
  0xfa   : > { %2088 = vmatpush1.bf16.msra.mxu1 %v2976_v50  ;;  %2048 = vmatprep.subr.bf16.mxu0 %v2981_v51  ;;  %v3074_v50 = vld [vmem:[%s3507_s8 + $0x64c] ss:$16 sps:$4 sm:$0xff]   ;;  %v3069_v51 = vld [vmem:[%s3507_s8 + $0x448] ss:$16 sps:$4 sm:$0xff]  }
  0xfb   : > { %2089 = vmatprep.subr.bf16.mxu1 %v2984_v52  ;;  %v3072_v52 = vld [vmem:[%s3507_s8 + $0x648] ss:$16 sps:$4 sm:$0xff]  }
  0xfd   : > { %2049 = vmatpush1.bf16.msra.mxu0 %v2979_v53  ;;  %v3077_v53 = vld [vmem:[%s3507_s8 + $0x42c] ss:$16 sps:$4 sm:$0xff]  }
  0xfe   : > { %2090 = vmatpush1.bf16.msra.mxu1 %v2982_v54  ;;  %2050 = vmatprep.subr.bf16.mxu0 %v2987_v55  ;;  %v3080_v54 = vld [vmem:[%s3507_s8 + $0x62c] ss:$16 sps:$4 sm:$0xff]   ;;  %v3075_v55 = vld [vmem:[%s3507_s8 + $0x428] ss:$16 sps:$4 sm:$0xff]  }
  0xff   : > { %2091 = vmatprep.subr.bf16.mxu1 %v2990_v56  ;;  %v3078_v56 = vld [vmem:[%s3507_s8 + $0x628] ss:$16 sps:$4 sm:$0xff]  }
 0x101   : > { %2051 = vmatpush1.bf16.msra.mxu0 %v2985_v57  ;;  %v3083_v57 = vld [vmem:[%s3507_s8 + $0x40c] ss:$16 sps:$4 sm:$0xff]  }
 0x102   : > { %2092 = vmatpush1.bf16.msra.mxu1 %v2988_v59  ;;  %2052 = vmatprep.subr.bf16.mxu0 %v2993_v60  ;;  %v3086_v59 = vld [vmem:[%s3507_s8 + $0x60c] ss:$16 sps:$4 sm:$0xff]   ;;  %v3081_v60 = vld [vmem:[%s3507_s8 + $0x408] ss:$16 sps:$4 sm:$0xff]  }
 0x103   : > { %2093 = vmatprep.subr.bf16.mxu1 %v2996_v61  ;;  %v3084_v61 = vld [vmem:[%s3507_s8 + $0x608] ss:$16 sps:$4 sm:$0xff]  }
 0x105   : > { %2053 = vmatpush2.bf16.msra.mxu0 %v2991_v63  ;;  %v3089_v63 = vld [vmem:[%s3507_s8 + $0x5ec] ss:$16 sps:$4 sm:$0xff]  }
 0x106   : > { %2094 = vmatpush2.bf16.msra.mxu1 %v2994_v0  ;;  %2054 = vmatprep.subr.bf16.mxu0 %v2999_v1  ;;  %v3092_v0 = vld [vmem:[%s3507_s8 + $0x7ec] ss:$16 sps:$4 sm:$0xff]   ;;  %v3087_v1 = vld [vmem:[%s3507_s8 + $0x5e8] ss:$16 sps:$4 sm:$0xff]  }
 0x107   : > { %2095 = vmatprep.subr.bf16.mxu1 %v3002_v2  ;;  %v3090_v2 = vld [vmem:[%s3507_s8 + $0x7e8] ss:$16 sps:$4 sm:$0xff]  }
 0x109   : > { %2055 = vmatpush2.bf16.msra.mxu0 %v2997_v3  ;;  %v3095_v3 = vld [vmem:[%s3507_s8 + $0x5cc] ss:$16 sps:$4 sm:$0xff]  }
 0x10a   : > { %2096 = vmatpush2.bf16.msra.mxu1 %v3000_v4  ;;  %2056 = vmatprep.subr.bf16.mxu0 %v3005_v5  ;;  %v3098_v4 = vld [vmem:[%s3507_s8 + $0x7cc] ss:$16 sps:$4 sm:$0xff]   ;;  %v3093_v5 = vld [vmem:[%s3507_s8 + $0x5c8] ss:$16 sps:$4 sm:$0xff]  }
 0x10b   : > { %2097 = vmatprep.subr.bf16.mxu1 %v3008_v6  ;;  %v3096_v6 = vld [vmem:[%s3507_s8 + $0x7c8] ss:$16 sps:$4 sm:$0xff]  }
 0x10d   : > { %2057 = vmatpush2.bf16.msra.mxu0 %v3003_v7  ;;  %v3101_v7 = vld [vmem:[%s3507_s8 + $0x5ac] ss:$16 sps:$4 sm:$0xff]  }
 0x10e   : > { %2098 = vmatpush2.bf16.msra.mxu1 %v3006_v8  ;;  %2058 = vmatprep.subr.bf16.mxu0 %v3011_v9  ;;  %v3104_v8 = vld [vmem:[%s3507_s8 + $0x7ac] ss:$16 sps:$4 sm:$0xff]   ;;  %v3099_v9 = vld [vmem:[%s3507_s8 + $0x5a8] ss:$16 sps:$4 sm:$0xff]  }
 0x10f   : > { %2099 = vmatprep.subr.bf16.mxu1 %v3014_v10  ;;  %v3102_v10 = vld [vmem:[%s3507_s8 + $0x7a8] ss:$16 sps:$4 sm:$0xff]  }
 0x111   : > { %2059 = vmatpush2.bf16.msra.mxu0 %v3009_v11  ;;  %v3107_v11 = vld [vmem:[%s3507_s8 + $0x58c] ss:$16 sps:$4 sm:$0xff]  }
 0x112   : > { %2100 = vmatpush2.bf16.msra.mxu1 %v3012_v12  ;;  %2060 = vmatprep.subr.bf16.mxu0 %v3017_v13  ;;  %v3110_v12 = vld [vmem:[%s3507_s8 + $0x78c] ss:$16 sps:$4 sm:$0xff]   ;;  %v3105_v13 = vld [vmem:[%s3507_s8 + $0x588] ss:$16 sps:$4 sm:$0xff]  }
 0x113   : > { %2101 = vmatprep.subr.bf16.mxu1 %v3020_v14  ;;  %v3108_v14 = vld [vmem:[%s3507_s8 + $0x788] ss:$16 sps:$4 sm:$0xff]  }
 0x115   : > { %2061 = vmatpush2.bf16.msra.mxu0 %v3015_v15  ;;  %v3113_v15 = vld [vmem:[%s3507_s8 + $0x56c] ss:$16 sps:$4 sm:$0xff]  }
 0x116   : > { %2102 = vmatpush2.bf16.msra.mxu1 %v3018_v16  ;;  %2062 = vmatprep.subr.bf16.mxu0 %v3023_v19  ;;  %v3116_v16 = vld [vmem:[%s3507_s8 + $0x76c] ss:$16 sps:$4 sm:$0xff]   ;;  %v3111_v19 = vld [vmem:[%s3507_s8 + $0x568] ss:$16 sps:$4 sm:$0xff]  }
 0x117   : > { %2103 = vmatprep.subr.bf16.mxu1 %v3026_v20  ;;  %v3114_v20 = vld [vmem:[%s3507_s8 + $0x768] ss:$16 sps:$4 sm:$0xff]  }
 0x119   : > { %2063 = vmatpush2.bf16.msra.mxu0 %v3021_v21  ;;  %v3119_v21 = vld [vmem:[%s3507_s8 + $0x54c] ss:$16 sps:$4 sm:$0xff]  }
 0x11a   : > { %2104 = vmatpush2.bf16.msra.mxu1 %v3024_v22  ;;  %2064 = vmatprep.subr.bf16.mxu0 %v3029_v23  ;;  %v3122_v22 = vld [vmem:[%s3507_s8 + $0x74c] ss:$16 sps:$4 sm:$0xff]   ;;  %v3117_v23 = vld [vmem:[%s3507_s8 + $0x548] ss:$16 sps:$4 sm:$0xff]  }
 0x11b   : > { %2105 = vmatprep.subr.bf16.mxu1 %v3032_v24  ;;  %v3120_v24 = vld [vmem:[%s3507_s8 + $0x748] ss:$16 sps:$4 sm:$0xff]  }
 0x11d   : > { %2065 = vmatpush2.bf16.msra.mxu0 %v3027_v25  ;;  %v3125_v25 = vld [vmem:[%s3507_s8 + $0x52c] ss:$16 sps:$4 sm:$0xff]  }
 0x11e   : > { %2106 = vmatpush2.bf16.msra.mxu1 %v3030_v26  ;;  %2066 = vmatprep.subr.bf16.mxu0 %v3035_v29  ;;  %v3128_v26 = vld [vmem:[%s3507_s8 + $0x72c] ss:$16 sps:$4 sm:$0xff]   ;;  %v3123_v29 = vld [vmem:[%s3507_s8 + $0x528] ss:$16 sps:$4 sm:$0xff]  }
 0x11f   : > { %2107 = vmatprep.subr.bf16.mxu1 %v3038_v30  ;;  %v3126_v30 = vld [vmem:[%s3507_s8 + $0x728] ss:$16 sps:$4 sm:$0xff]  }
 0x121   : > { %2067 = vmatpush2.bf16.msra.mxu0 %v3033_v31  ;;  %v3131_v31 = vld [vmem:[%s3507_s8 + $0x50c] ss:$16 sps:$4 sm:$0xff]  }
 0x122   : > { %2108 = vmatpush2.bf16.msra.mxu1 %v3036_v32  ;;  %2118 = vmatprep.subr.bf16.mxu0 %v3041_v33  ;;  %v3134_v32 = vld [vmem:[%s3507_s8 + $0x70c] ss:$16 sps:$4 sm:$0xff]   ;;  %v3129_v33 = vld [vmem:[%s3507_s8 + $0x508] ss:$16 sps:$4 sm:$0xff]  }
 0x123   : > { %2159 = vmatprep.subr.bf16.mxu1 %v3044_v34  ;;  %v3132_v34 = vld [vmem:[%s3507_s8 + $0x708] ss:$16 sps:$4 sm:$0xff]  }
 0x124   : > { %2069 = vmatmul.mubr.bf16.vlgmr.msra.gmra.mxu0 %v3610_v17  ;;  %v3051_v17 = vld [vmem:[%s3507_s8 + $0x4a8] ss:$16 sps:$4 sm:$0xff]  }
 0x125   : > { %2110 = vmatmul.mubr.bf16.vlgmr.msra.gmra.mxu1 %v3612_v18  ;;  %2119 = vmatpush1.bf16.msra.mxu0 %v3039_v35  ;;  %v3054_v18 = vld [vmem:[%s3507_s8 + $0x6a8] ss:$16 sps:$4 sm:$0xff]  }
 0x126   : > { %2160 = vmatpush1.bf16.msra.mxu1 %v3042_v36  ;;  %2120 = vmatprep.subr.bf16.mxu0 %v3047_v37 }
 0x127   : > { %2161 = vmatprep.subr.bf16.mxu1 %v3050_v38  ;;  %2150 = vmatprep.mubr.bf16.mxu0 %v3650_v47  ;;  %v3060_v47 = vld [vmem:[%s3507_s8 + $0x688] ss:$16 sps:$4 sm:$0xff]  }
 0x128   : > { %2191 = vmatprep.mubr.bf16.mxu1 %v3654_v48  ;;  %v3065_v48 = vld [vmem:[%s3507_s8 + $0x46c] ss:$16 sps:$4 sm:$0xff]   ;;  %s2221_s8 = scalar_lea.hbm %s3906_s3, %s2632_s18 }
 0x129   : > { %2121 = vmatpush1.bf16.msra.mxu0 %v3045_v39 }
 0x12a   : > { %2162 = vmatpush1.bf16.msra.mxu1 %v3048_v40  ;;  %2122 = vmatprep.subr.bf16.mxu0 %v3053_v41 }
 0x12b   : > { %2163 = vmatprep.subr.bf16.mxu1 %v3056_v42 }
 0x12d   : > { %2123 = vmatpush1.bf16.msra.mxu0 %v3051_v17 }
 0x12e   : > { %2164 = vmatpush1.bf16.msra.mxu1 %v3054_v18  ;;  %2124 = vmatprep.subr.bf16.mxu0 %v3059_v58 }
 0x12f   : > { %2165 = vmatprep.subr.bf16.mxu1 %v3062_v62 }
 0x131   : > { %2125 = vmatpush1.bf16.msra.mxu0 %v3057_v43 }
 0x132   : > { %2166 = vmatpush1.bf16.msra.mxu1 %v3060_v47  ;;  %2126 = vmatprep.subr.bf16.mxu0 %v3065_v48  ;;  %v300_v47 = vld [vmem:[%s3529_s1] sm:$0xff] }
 0x133   : > { %2167 = vmatprep.subr.bf16.mxu1 %v3068_v44 }
 0x135   : > { %2127 = vmatpush1.bf16.msra.mxu0 %v3063_v45 }
 0x136   : > { %2168 = vmatpush1.bf16.msra.mxu1 %v3066_v46  ;;  %2128 = vmatprep.subr.bf16.mxu0 %v3071_v49 }
 0x137   : > { %2169 = vmatprep.subr.bf16.mxu1 %v3074_v50 }
 0x139   : > { %2129 = vmatpush1.bf16.msra.mxu0 %v3069_v51 }
 0x13a   : > { %2170 = vmatpush1.bf16.msra.mxu1 %v3072_v52  ;;  %2130 = vmatprep.subr.bf16.mxu0 %v3077_v53 }
 0x13b   : > { %2171 = vmatprep.subr.bf16.mxu1 %v3080_v54 }
 0x13d   : > { %2131 = vmatpush1.bf16.msra.mxu0 %v3075_v55 }
 0x13e   : > { %2172 = vmatpush1.bf16.msra.mxu1 %v3078_v56  ;;  %2132 = vmatprep.subr.bf16.mxu0 %v3083_v57 }
 0x13f   : > { %2173 = vmatprep.subr.bf16.mxu1 %v3086_v59 }
 0x141   : > { %2133 = vmatpush1.bf16.msra.mxu0 %v3081_v60 }
 0x142   : > { %2174 = vmatpush1.bf16.msra.mxu1 %v3084_v61  ;;  %2134 = vmatprep.subr.bf16.mxu0 %v3089_v63 }
 0x143   : > { %2175 = vmatprep.subr.bf16.mxu1 %v3092_v0 }
 0x145   : > { %2135 = vmatpush2.bf16.msra.mxu0 %v3087_v1 }
 0x146   : > { %2176 = vmatpush2.bf16.msra.mxu1 %v3090_v2  ;;  %2136 = vmatprep.subr.bf16.mxu0 %v3095_v3 }
 0x147   : > { %2177 = vmatprep.subr.bf16.mxu1 %v3098_v4 }
 0x149   : > { %2137 = vmatpush2.bf16.msra.mxu0 %v3093_v5 }
 0x14a   : > { %2178 = vmatpush2.bf16.msra.mxu1 %v3096_v6  ;;  %2138 = vmatprep.subr.bf16.mxu0 %v3101_v7  ;;  %v302_v6 = vld [vmem:[%s3529_s1 + $0x10] sm:$0xff] }
 0x14b   : > { %2179 = vmatprep.subr.bf16.mxu1 %v3104_v8 }
 0x14d   : > { %2139 = vmatpush2.bf16.msra.mxu0 %v3099_v9 }
 0x14e   : > { %2180 = vmatpush2.bf16.msra.mxu1 %v3102_v10  ;;  %2140 = vmatprep.subr.bf16.mxu0 %v3107_v11  ;;  %v303_v11 = vld [vmem:[%s3529_s1 + $0x18] sm:$0xff] }
 0x14f   : > { %2181 = vmatprep.subr.bf16.mxu1 %v3110_v12 }
 0x151   : > { %2141 = vmatpush2.bf16.msra.mxu0 %v3105_v13 }
 0x152   : > { %2182 = vmatpush2.bf16.msra.mxu1 %v3108_v14  ;;  %2142 = vmatprep.subr.bf16.mxu0 %v3113_v15 }
 0x153   : > { %2183 = vmatprep.subr.bf16.mxu1 %v3116_v16 }
 0x155   : > { %2143 = vmatpush2.bf16.msra.mxu0 %v3111_v19 }
 0x156   : > { %2184 = vmatpush2.bf16.msra.mxu1 %v3114_v20  ;;  %2144 = vmatprep.subr.bf16.mxu0 %v3119_v21 }
 0x157   : > { %2185 = vmatprep.subr.bf16.mxu1 %v3122_v22 }
 0x159   : > { %2145 = vmatpush2.bf16.msra.mxu0 %v3117_v23 }
 0x15a   : > { %2186 = vmatpush2.bf16.msra.mxu1 %v3120_v24  ;;  %2146 = vmatprep.subr.bf16.mxu0 %v3125_v25 }
 0x15b   : > { %2187 = vmatprep.subr.bf16.mxu1 %v3128_v26 }
 0x15d   : > { %2147 = vmatpush2.bf16.msra.mxu0 %v3123_v29 }
 0x15e   : > { %2188 = vmatpush2.bf16.msra.mxu1 %v3126_v30  ;;  %2148 = vmatprep.subr.bf16.mxu0 %v3131_v31 }
 0x15f   : > { %2189 = vmatprep.subr.bf16.mxu1 %v3134_v32 }
 0x161   : > { %2149 = vmatpush2.bf16.msra.mxu0 %v3129_v33 }
 0x162   : > { %2190 = vmatpush2.bf16.msra.mxu1 %v3132_v34 }
 0x164   : > { %v1906_v35 = vpop.f32.mrf.mxu0  ;;  %2151 = vmatmul.mubr.bf16.vlgmr.msra.gmra.mxu0 %v3698_v27 }
 0x165   : > { %v1947_v36 = vpop.f32.mrf.mxu1  ;;  %2192 = vmatmul.mubr.bf16.vlgmr.msra.gmra.mxu1 %v3702_v28  ;;  %v301_v28 = vld [vmem:[%s3529_s1 + $0x8] sm:$0xff] }
 0x166   : > { %v1908_v37 = vpop.f32.mrf.mxu0  ;;  %v1948_v17 = vadd.f32 %v1947_v36, %v1906_v35 }
 0x167   : > { %v1949_v38 = vpop.f32.mrf.mxu1 }
 0x168   : > { %v1910_v39 = vpop.f32.mrf.mxu0  ;;  %v1950_v62 = vadd.f32 %v1949_v38, %v1908_v37 }
 0x169   : > { %v1951_v40 = vpop.f32.mrf.mxu1 }
 0x16a   : > { %v1911_v41 = vpop.f32.mrf.mxu0 }
 0x16b   : > { %v1952_v42 = vpop.f32.mrf.mxu1 }
 0x1a4   : > { %v1988_v18 = vpop.f32.mrf.mxu0 }
 0x1a5   : > { %v2029_v58 = vpop.f32.mrf.mxu1  ;;  %v1989_v43 = vadd.f32 %v1988_v18, %v1948_v17 }
 0x1a6   : > { %v1990_v48 = vpop.f32.mrf.mxu0 }
 0x1a7   : > { %v2031_v44 = vpop.f32.mrf.mxu1  ;;  %v2030_v27 = vadd.f32 %v2029_v58, %v1989_v43  ;;  %v1991_v45 = vadd.f32 %v1990_v48, %v1950_v62 }
 0x1a8   : > { %v1992_v46 = vpop.f32.mrf.mxu0 }
 0x1a9   : > { %v2033_v49 = vpop.f32.mrf.mxu1  ;;  %v2200_v50 = vadd.f32 %v2030_v27, %v300_v47  ;;  %v2032_v51 = vadd.f32 %v2031_v44, %v1991_v45 }
 0x1aa   : > { %v1993_v52 = vpop.f32.mrf.mxu0 }
 0x1ab   : > { %v2034_v53 = vpop.f32.mrf.mxu1  ;;  %2204 = vst [vmem:[%s3529_s1] sm:$0xff] %v2200_v50  ;;  %v2201_v54 = vadd.f32 %v2032_v51, %v301_v28 }
 0x1ad   : > { %2205 = vst [vmem:[%s3529_s1 + $0x8] sm:$0xff] %v2201_v54 }
 0x1e4   : > { %v2070_v55 = vpop.f32.mrf.mxu0 }
 0x1e5   : > { %v2111_v56 = vpop.f32.mrf.mxu1 }
 0x1e6   : > { %v2072_v57 = vpop.f32.mrf.mxu0  ;;  %v2112_v1 = vadd.f32 %v2111_v56, %v2070_v55 }
 0x1e7   : > { %v2113_v59 = vpop.f32.mrf.mxu1 }
 0x1e8   : > { %v2074_v60 = vpop.f32.mrf.mxu0  ;;  %v2114_v4 = vadd.f32 %v2113_v59, %v2072_v57 }
 0x1e9   : > { %v2115_v61 = vpop.f32.mrf.mxu1 }
 0x1ea   : > { %v2075_v63 = vpop.f32.mrf.mxu0 }
 0x1eb   : > { %v2116_v0 = vpop.f32.mrf.mxu1 }
 0x224   : > { %v2152_v2 = vpop.f32.mrf.mxu0 }
 0x225   : > { %v2193_v3 = vpop.f32.mrf.mxu1  ;;  %v2153_v5 = vadd.f32 %v2152_v2, %v2112_v1 }
 0x226   : > { %v2154_v7 = vpop.f32.mrf.mxu0 }
 0x227   : > { %v2195_v8 = vpop.f32.mrf.mxu1  ;;  %v2194_v9 = vadd.f32 %v2193_v3, %v2153_v5  ;;  %v2155_v10 = vadd.f32 %v2154_v7, %v2114_v4 }
 0x228   : > { %v2156_v12 = vpop.f32.mrf.mxu0 }
 0x229   : > { %v2197_v13 = vpop.f32.mrf.mxu1  ;;  %v2202_v14 = vadd.f32 %v2194_v9, %v302_v6  ;;  %v2196_v15 = vadd.f32 %v2195_v8, %v2155_v10 }
 0x22a   : > { %v2157_v16 = vpop.f32.mrf.mxu0 }
 0x22b   : > { %v2198_v19 = vpop.f32.mrf.mxu1  ;;  %2206 = vst [vmem:[%s3529_s1 + $0x10] sm:$0xff] %v2202_v14  ;;  %v2203_v20 = vadd.f32 %v2196_v15, %v303_v11 }
 0x22d   : > { %2207 = vst [vmem:[%s3529_s1 + $0x18] sm:$0xff] %v2203_v20 }
 0x22e   : > { %3204 = shalt.err (!%p3201_p6)
}
 0x22f   : > { %s3205_s7 = scalar_lea.hbm %s2221_s8, 512  ;;  %s3209_s29 = scalar_lea.hbm %s3906_s3, 1024 }
 0x230   : > { %p3206_p0 = scmp.ne.s32.totalorder %s2221_s8, %s3205_s7  ;;  %p3210_p8 = scmp.lt.s32.totalorder %s2221_s8, %s3906_s3 }
 0x231   : > { %p3211_p4 = scmp.lt.s32.totalorder %s3209_s29, %s3205_s7 }
 0x232   : > { %p3207_p13 = pnand %p3206_p0, %p3925_p11 }
 0x233   : > { %p3212_p7 = por %p3211_p4, %p3210_p8 }
 0x234   : > { %p3208_p1 = pneg %p3207_p13 }
 0x236   : > { %p3213_p10 = pnand %p3212_p7, %p3208_p1 }
 0x238   : > { %3216 = shalt.err (!%p3213_p10)
}
 0x239   : > { %2637 = dma.vmem_to_hbm [thread:$0]  (%p3925_p11), %s2224_s15, 512, %s2221_s8, %s2209_s23  }
 0x23a PF: > { %p2651_p3 = scmp.ge.s32.totalorder %s3315_s22, 2  ;;  %s2235_s1 = sand.u32 1, %s3275_s12  }
 0x23b   : > { %p3926_p5 = scmp.ne.s32.totalorder %s3923_s6, 0  ;;  %s2236_s18 = scalar_lea.sflag [#allocation4], %s2235_s1 }
 0x23d   : > { %p2647_p9 = pnand %p2651_p3, %p3926_p5 }
 0x23f   : > { %p2648_p12 = pneg %p2647_p9 }
 0x241   : > { %3270 = dma.done.wait (%p2648_p12), %s2236_s18, 512  }
 0x242   : > { %3272 = vsyncadd (%p2648_p12), %s2236_s18, 4294966784  ;;  %s22_s22 = sadd.s32 1, %s3315_s22   ;;  %s3927_s19 = sld [smem:[#allocation11_spill]] }
 0x243   : > { %p19_p2 = scmp.ge.s32.totalorder %s22_s22, 10   ;;  %s3928_s27 = sld [smem:[#allocation12_spill]] }
 0x244   : > { %s3929_s21 = sld [smem:[#allocation13_spill]]  ;;  %s3930_s12 = smov %s3279_s13 }
 0x245   : > { %s3931_s13 = smov %s3283_s14  ;;  %s3932_s14 = smov %s3473_s28 }
 0x246   : > { %s3933_s15 = smov %s3291_s16  ;;  %s3934_s16 = smov %s3295_s17 }
 0x247   : > { %s3935_s17 = smov %s3478_s30  ;;  %s3936_s18 = smov %s3307_s20 }
 0x248   :  { %21 = sbr.rel (!%p19_p2) target bundleno = 13 (0xd), region = 97 }
 0x249   : > { %s3937_s20 = smov %s3928_s27 }
 0x24d   :  { %2241 = vsyncpa [#allocation3], 1 }
 0x24e   :  { %2243 = vsyncpa [#allocation3 + $0x1], 1 }
 0x24f   :  { %2244 = vsyncpa [#allocation6], 1 }
 0x250   :  { %2246 = vsyncpa [#allocation6 + $0x1], 1 }
 0x251   :  { %2247 = vsyncpa [#allocation4], 1 }
 0x252   :  { %2249 = vsyncpa [#allocation4 + $0x1], 1 }

</bundles_post_ra>
